<compile_context>
chip_gen: v7x
topology: tpu7x:2x2x1
jax: 0.10.0
libtpu: 0.0.40
codegen_flags: <defaults>
</compile_context>

<pallas_src>
import functools
import numpy as np
import jax
import jax.numpy as jnp
from jax.experimental import pallas as pl
from jax.experimental.pallas import tpu as pltpu


# ----------------------------------------------------------------------------
# Kernels: one (batch, token-tile) step.
#   x_ref : (1, C, T)   channels x tokens (tokens on the 128-lane axis)
#   g_ref : (C, 1)      LayerNorm gamma (f32)
#   b_ref : (C, 1)      LayerNorm beta  (f32)
#   o_ref : (1, T, C)   tokens x channels
# ----------------------------------------------------------------------------
def _patch_embed_norm_kernel(x_ref, g_ref, b_ref, o_ref, *, eps):
    x = x_ref[0].astype(jnp.float32)                      # (C, T) f32 accumulation
    # LayerNorm over the channel axis while T is on lanes: every VPU/XLU op
    # runs on full, unmasked vregs.
    mean = jnp.mean(x, axis=0, keepdims=True)             # (1, T)
    xc = x - mean
    var = jnp.mean(xc * xc, axis=0, keepdims=True)        # biased, as PyTorch LN
    inv = jax.lax.rsqrt(var + eps)                        # EUP
    y = xc * inv * g_ref[...] + b_ref[...]                # (C,1) broadcast on lanes
    # Cast BEFORE the transpose (elementwise => bit-identical), then one XLU
    # transpose to the output layout.
    o_ref[0] = y.astype(o_ref.dtype).T                    # (T, C)


def _patch_embed_copy_kernel(x_ref, o_ref):
    # norm_layer=None path: pure flatten+transpose, native dtype, no f32 trip.
    o_ref[0] = x_ref[0].T                                 # (T, C)


# ----------------------------------------------------------------------------
# VMEM- and C-aware token-tile selection
# ----------------------------------------------------------------------------
def _pick_token_tile(hw_pad, c, itemsize, apply_norm, batch,
                     budget_bytes=12 * 1024 * 1024, min_steps=8):
    c_lane = ((c + 127) // 128) * 128                     # lane-padded C of the (T,C) tile
    per_tok = 2 * c * itemsize                            # input block, double-buffered
    per_tok += 2 * c_lane * itemsize                      # output block, double-buffered
    per_tok += (2 * c * 4) if apply_norm else (c * 4)     # in-kernel temporaries (f32)
    t_max = max(128, budget_bytes // per_tok)

    tile = 128
    for cand in (1024, 512, 256, 128):                    # >=512 already ~85% of HBM BW
        if cand <= t_max and hw_pad % cand == 0:
            tile = cand
            break
    # Keep enough grid steps for pipelining and for both v7x TensorCores.
    while tile > 128 and batch * (hw_pad // tile) < min_steps:
        tile //= 2
    return tile


# ----------------------------------------------------------------------------
# Wrapper
# ----------------------------------------------------------------------------
def patch_embed(x, gamma=None, beta=None, *, eps=1e-5, token_tile=None):
    """PatchEmbed.forward: (B, C, H, W) -> (B, H*W, C), optional LayerNorm(C)."""
    B, C, H, W = x.shape
    HW = H * W
    itemsize = jnp.dtype(x.dtype).itemsize
    apply_norm = gamma is not None

    x2 = x.reshape(B, C, HW)                              # flatten(2): free reshape

    # Pad the token axis to a multiple of 128 so blocks are always lane-aligned
    # (no full-HW fallback).  Padded tokens are computed and sliced off.
    HW_pad = -(-HW // 128) * 128
    if HW_pad != HW:
        x2 = jnp.pad(x2, ((0, 0), (0, 0), (0, HW_pad - HW)))

    if token_tile is None:
        T = _pick_token_tile(HW_pad, C, itemsize, apply_norm, B)
    else:
        T = token_tile
        assert HW_pad % T == 0 and T % 128 == 0, "token_tile must be a 128-multiple dividing padded H*W"

    x_spec = pl.BlockSpec((1, C, T), lambda bi, ti: (bi, 0, ti))
    o_spec = pl.BlockSpec((1, T, C), lambda bi, ti: (bi, ti, 0))

    if apply_norm:
        g = jnp.asarray(gamma, jnp.float32).reshape(C, 1)
        b = jnp.asarray(beta, jnp.float32).reshape(C, 1)
        kernel = functools.partial(_patch_embed_norm_kernel, eps=eps)
        in_specs = [x_spec,
                    pl.BlockSpec((C, 1), lambda bi, ti: (0, 0)),
                    pl.BlockSpec((C, 1), lambda bi, ti: (0, 0))]
        args = (x2, g, b)
    else:
        kernel = _patch_embed_copy_kernel
        in_specs = [x_spec]
        args = (x2,)

    cost = pl.CostEstimate(
        flops=(5 * B * C * HW) if apply_norm else 0,
        transcendentals=(B * HW) if apply_norm else 0,
        bytes_accessed=2 * B * C * HW * itemsize,
    )

    out = pl.pallas_call(
        kernel,
        out_shape=jax.ShapeDtypeStruct((B, HW_pad, C), x.dtype),
        grid_spec=pltpu.PrefetchScalarGridSpec(
            num_scalar_prefetch=0,
            grid=(B, HW_pad // T),
            in_specs=in_specs,
            out_specs=o_spec,
        ),
        compiler_params=pltpu.CompilerParams(
            dimension_semantics=("parallel", "parallel")),
        cost_estimate=cost,
    )(*args)

    if HW_pad != HW:
        out = out[:, :HW, :]
    return out


# ----------------------------------------------------------------------------
# Pure-JAX reference (mirrors the PyTorch forward) for verification
# ----------------------------------------------------------------------------
def reference_forward(x, gamma=None, beta=None, eps=1e-5):
    B, C, H, W = x.shape
    out = jnp.transpose(x.reshape(B, C, H * W), (0, 2, 1))            # (B, HW, C)
    if gamma is not None:
        o32 = out.astype(jnp.float32)
        mean = o32.mean(-1, keepdims=True)
        var = ((o32 - mean) ** 2).mean(-1, keepdims=True)
        o32 = (o32 - mean) / jnp.sqrt(var + eps) * gamma + beta
        out = o32.astype(out.dtype)
    return out


if __name__ == "__main__":
    key = jax.random.PRNGKey(0)
    kx, kg, kb, kx2 = jax.random.split(key, 4)

    # small shapes: embed_dim=96 (module default), 16x16 patch grid, batch=2
    B, C, H, W = 2, 96, 16, 16
    x = jax.random.normal(kx, (B, C, H, W), jnp.float32)
    gamma = 1.0 + 0.1 * jax.random.normal(kg, (C,), jnp.float32)
    beta = 0.1 * jax.random.normal(kb, (C,), jnp.float32)

    # 1) norm_layer = LayerNorm path
    out = jax.block_until_ready(patch_embed(x, gamma, beta))
    np.testing.assert_allclose(np.asarray(out),
                               np.asarray(reference_forward(x, gamma, beta)),
                               rtol=1e-4, atol=1e-4)

    # 2) norm_layer = None path (pure flatten + transpose, native dtype)
    out2 = jax.block_until_ready(patch_embed(x))
    np.testing.assert_array_equal(np.asarray(out2), np.asarray(reference_forward(x)))

    # 3) token count not a multiple of 128 (12x12 = 144 tokens) -> wrapper pads/slices
    xu = jax.random.normal(kx2, (B, C, 12, 12), jnp.float32)
    out3 = jax.block_until_ready(patch_embed(xu, gamma, beta))
    np.testing.assert_allclose(np.asarray(out3),
                               np.asarray(reference_forward(xu, gamma, beta)),
                               rtol=1e-4, atol=1e-4)

    # 4) bf16 no-norm path (no f32 round-trip; exact data movement)
    xb = x.astype(jnp.bfloat16)
    out4 = jax.block_until_ready(patch_embed(xb))
    np.testing.assert_array_equal(np.asarray(out4.astype(jnp.float32)),
                                  np.asarray(reference_forward(xb).astype(jnp.float32)))

    print("KERNEL_OK")
</pallas_src>

<mosaic_0001>
module attributes {stable_mosaic.version = 11 : i64} {
  func.func @_patch_embed_norm_kernel(%arg0: i32, %arg1: i32, %arg2: memref<1x96x128xf32, #tpu.memory_space<vmem>>, %arg3: memref<96x1xf32, #tpu.memory_space<vmem>>, %arg4: memref<96x1xf32, #tpu.memory_space<vmem>>, %arg5: memref<1x128x96xf32, #tpu.memory_space<vmem>>) attributes {dimension_semantics = [#tpu.dimension_semantics<parallel>, #tpu.dimension_semantics<parallel>], iteration_bounds = array<i64: 2, 2>, scalar_prefetch = 0 : i64, scratch_operands = 0 : i64, tpu.core_type = #tpu.core_type<tc>, window_params = [{transform_indices = @transform_0, window_bounds = array<i64: 1, 96, 128>}, {pipeline_mode = #tpu.pipeline_mode<synchronous>, transform_indices = @transform_1, window_bounds = array<i64: 96, 1>}, {pipeline_mode = #tpu.pipeline_mode<synchronous>, transform_indices = @transform_2, window_bounds = array<i64: 96, 1>}, {transform_indices = @transform_3, window_bounds = array<i64: 1, 128, 96>}]} {
    %c0 = arith.constant 0 : index
    %c0_0 = arith.constant 0 : index
    %c0_1 = arith.constant 0 : index
    %0 = vector.load %arg2[%c0, %c0_0, %c0_1] : memref<1x96x128xf32, #tpu.memory_space<vmem>>, vector<1x96x128xf32>
    %1 = vector.shape_cast %0 : vector<1x96x128xf32> to vector<96x128xf32>
    %cst = arith.constant dense<0.000000e+00> : vector<128xf32>
    %2 = vector.multi_reduction <add>, %1, %cst [0] : vector<96x128xf32> to vector<128xf32>
    %3 = vector.shape_cast %2 : vector<128xf32> to vector<1x128xf32>
    %cst_2 = arith.constant 9.600000e+01 : f32
    %4 = vector.broadcast %cst_2 : f32 to vector<1x128xf32>
    %5 = arith.divf %3, %4 : vector<1x128xf32>
    %6 = vector.broadcast %5 : vector<1x128xf32> to vector<96x128xf32>
    %7 = arith.subf %1, %6 : vector<96x128xf32>
    %8 = arith.mulf %7, %7 : vector<96x128xf32>
    %cst_3 = arith.constant dense<0.000000e+00> : vector<128xf32>
    %9 = vector.multi_reduction <add>, %8, %cst_3 [0] : vector<96x128xf32> to vector<128xf32>
    %10 = vector.shape_cast %9 : vector<128xf32> to vector<1x128xf32>
    %cst_4 = arith.constant 9.600000e+01 : f32
    %11 = vector.broadcast %cst_4 : f32 to vector<1x128xf32>
    %12 = arith.divf %10, %11 : vector<1x128xf32>
    %cst_5 = arith.constant 9.99999974E-6 : f32
    %13 = vector.broadcast %cst_5 : f32 to vector<1x128xf32>
    %14 = arith.addf %12, %13 : vector<1x128xf32>
    %15 = math.rsqrt %14 : vector<1x128xf32>
    %16 = vector.broadcast %15 : vector<1x128xf32> to vector<96x128xf32>
    %17 = arith.mulf %7, %16 : vector<96x128xf32>
    %c0_6 = arith.constant 0 : index
    %c0_7 = arith.constant 0 : index
    %18 = vector.load %arg3[%c0_6, %c0_7] : memref<96x1xf32, #tpu.memory_space<vmem>>, vector<96x1xf32>
    %19 = vector.broadcast %18 : vector<96x1xf32> to vector<96x128xf32>
    %20 = arith.mulf %17, %19 : vector<96x128xf32>
    %c0_8 = arith.constant 0 : index
    %c0_9 = arith.constant 0 : index
    %21 = vector.load %arg4[%c0_8, %c0_9] : memref<96x1xf32, #tpu.memory_space<vmem>>, vector<96x1xf32>
    %22 = vector.broadcast %21 : vector<96x1xf32> to vector<96x128xf32>
    %23 = arith.addf %20, %22 : vector<96x128xf32>
    %24 = tpu.transpose %23, [1, 0] : vector<96x128xf32> -> vector<128x96xf32>
    %c0_10 = arith.constant 0 : index
    %c0_11 = arith.constant 0 : index
    %c0_12 = arith.constant 0 : index
    %25 = vector.load %arg5[%c0_10, %c0_11, %c0_12] : memref<1x128x96xf32, #tpu.memory_space<vmem>>, vector<1x128x96xf32>
    %26 = vector.shape_cast %25 : vector<1x128x96xf32> to vector<128x96xf32>
    %27 = vector.shape_cast %24 : vector<128x96xf32> to vector<1x128x96xf32>
    tpu.vector_store %arg5[%c0_10, %c0_11, %c0_12], %27 {strides = array<i32>} : memref<1x128x96xf32, #tpu.memory_space<vmem>>, vector<1x128x96xf32>,
    return
  }
  func.func @transform_0(%arg0: i32, %arg1: i32) -> (i32, i32, i32) {
    %c0_i32 = arith.constant 0 : i32
    %c0_i32_0 = arith.constant 0 : i32
    return %arg0, %c0_i32, %arg1 : i32, i32, i32
  }
  func.func @transform_1(%arg0: i32, %arg1: i32) -> (i32, i32) {
    %c0_i32 = arith.constant 0 : i32
    %c0_i32_0 = arith.constant 0 : i32
    %c0_i32_1 = arith.constant 0 : i32
    return %c0_i32, %c0_i32_0 : i32, i32
  }
  func.func @transform_2(%arg0: i32, %arg1: i32) -> (i32, i32) {
    %c0_i32 = arith.constant 0 : i32
    %c0_i32_0 = arith.constant 0 : i32
    %c0_i32_1 = arith.constant 0 : i32
    return %c0_i32, %c0_i32_0 : i32, i32
  }
  func.func @transform_3(%arg0: i32, %arg1: i32) -> (i32, i32, i32) {
    %c0_i32 = arith.constant 0 : i32
    %c0_i32_0 = arith.constant 0 : i32
    return %arg0, %arg1, %c0_i32 : i32, i32, i32
  }
}

</mosaic_0001>

<bundles_post_ra>
// kernel: tpu_custom_call.1
= control target key start
LH: loop header
LB: loop body
LE: loop exit
PB: predicated region body
PF: predicated region fallthrough
CT: control target
= control target key end

     0   :  { %8 = vsyncpa [#allocation3], 0  ;;  %s1168_s0 = inlined_call_operand.hbm [shape: f32[2,96,256], index: 0, kind: input, shape index: {}]   ;;  %s1169_s1 = inlined_call_operand.vmem [shape: f32[96,1], index: 1, kind: input, shape index: {}]   ;;  %s1170_s2 = inlined_call_operand.vmem [shape: f32[96,1], index: 2, kind: input, shape index: {}]   ;;  %s1171_s3 = inlined_call_operand.vmem [shape: f32[2,256,96], index: 3, kind: output, shape index: {}]  }
   0x1   :  { %10 = vsyncpa [#allocation3 + $0x1], 0  ;;  %s835_s12 = smov 0   ;;  %s837_s13 = smov 0  }
   0x2   :  { %s839_s14 = smov 0   ;;  %s841_s15 = smov 0  }
   0x3   :  { %s843_s16 = smov 0   ;;  %s845_s17 = smov 0  }
   0x4   :  { %s847_s18 = smov 0   ;;  %s849_s19 = smov 0  }
   0x5 LB: > { %s618_s20 = sadd.s32 4294967295, %s808_s19   ;;  %s25_s21 = sadd.s32 1, %s800_s17  ;;  %s808_s19 = sphi %s849_s19, %s16_s19   ;;  %s804_s18 = sphi %s847_s18, %s1181_s18   ;;  %s800_s17 = sphi %s845_s17, %s1180_s17   ;;  %s796_s16 = sphi %s843_s16, %s1179_s16   ;;  %s792_s15 = sphi %s841_s15, %s1178_s15   ;;  %s788_s14 = sphi %s839_s14, %s1177_s14   ;;  %s784_s13 = sphi %s837_s13, %s1176_s13   ;;  %s780_s12 = sphi %s835_s12, %s1175_s12  }
   0x6   : > { %p26_p0 = scmp.ge.s32.totalorder %s25_s21, 2  ;;  %s28_s22 = sadd.s32 1, %s804_s18 }
   0x7   : > { %s37_s23 = sadd.s32 1, %s788_s14  ;;  %p44_p1 = scmp.ne.s32.totalorder %s788_s14, %s784_s13 }
   0x8   : > { %s1183_s21 = smov (%p26_p0, %s25_s21), 0  ;;  %s1185_s22 = smov (!%p26_p0, %s28_s22), %s804_s18 }
   0x9   : > { %s33_s24 = ssub.s32 %s800_s17, %s1183_s21  ;;  %p45_p2 = scmp.eq.s32.totalorder %s808_s19, 0 }
   0xa   : > { %p30_p3 = scmp.ge.s32.totalorder %s1185_s22, 2  ;;  %p50_p4 = scmp.ne.s32.totalorder %s784_s13, %s780_s12 }
   0xb   : > { %p46_p5 = por %p45_p2, %p44_p1  ;;  %p51_p6 = scmp.eq.s32.totalorder %s618_s20, 0 }
   0xc   : > { %s1187_s22 = smov (%p30_p3, %s1185_s22), 0  ;;  %p638_p8 = scmp.lt.s32.totalorder %s808_s19, 4 }
   0xd   : > { %p888_p7 = por %p51_p6, %p50_p4  ;;  %s32_s26 = ssub.s32 %s804_s18, %s1187_s22 }
   0xe   : > { %s34_s27 = sor.u32 %s33_s24, %s32_s26  ;;  %s150_s28 = sand.u32 1, %s788_s14  }
   0xf   : > { %p35_p9 = scmp.eq.s32.totalorder %s34_s27, 0  ;;  %s629_s29 = smul.u32 96, %s150_s28 }
  0x10   : > { %p896_p10 = pnand %p638_p8, %p46_p5  ;;  %s630_s5 = smul.u32 24, %s804_s18 }
  0x11   : > { %s901_s4 = scalar_select %p35_p9, %s788_s14, %s37_s23  }
  0x12   : > { %s154_s6 = scalar_lea.vmem [#allocation2], %s629_s29  ;;  %s159_s8 = sadd.s32 %s800_s17, %s630_s5 }
  0x13   : > { %s162_s7 = sshll.u32 %s154_s6, 4  ;;  %s622_s9 = sshll.u32 %s159_s8, 7  ;;  %s905_s7 = int_to_ptr.vmem [resolvable:$true] %s162_s7 }
  0x14   : > { %s910_s12 = scalar_lea.hbm %s1168_s0, %s622_s9  ;;  %s913_s20 = scalar_lea.sflag [#allocation3], %s150_s28 }
  0x15   : > { %s712_s23 = scalar_lea.hbm %s910_s12, 1536  ;;  %p714_p13 = pneg %p896_p10 }
  0x16   : > { %p713_p12 = scmp.ne.s32.totalorder %s910_s12, %s712_s23  ;;  %s717_s27 = scalar_lea.hbm %s1168_s0, 6144 }
  0x17   : > { %p718_p2 = scmp.lt.u32.totalorder %s910_s12, %s1168_s0  ;;  %p719_p3 = scmp.lt.u32.totalorder %s717_s27, %s712_s23 }
  0x18   : > { %p715_p0 = pnand %p714_p13, %p713_p12  ;;  %p721_p5 = scmp.lt.u32.totalorder %s712_s23, %s910_s12 }
  0x19   : > { %p720_p4 = por %p719_p3, %p718_p2 }
  0x1a   : > { %p716_p1 = pneg %p715_p0 }
  0x1b   : > { %p722_p6 = por %p721_p5, %p720_p4 }
  0x1d   : > { %p723_p8 = pnand %p722_p6, %p716_p1 }
  0x1f   : > { %726 = shalt.err (!%p723_p8)
}
  0x20   : > { %s727_s28 = scalar_lea.vmem %s905_s7, 1536  ;;  %s810_s6 = smov [#allocation2]  }
  0x21   : > { %p728_p9 = scmp.ne.s32.totalorder %s905_s7, %s727_s28  ;;  %s732_s8 = sshll.u32 %s810_s6, 4  ;;  %s733_s8 = int_to_ptr.vmem [resolvable:$false] %s732_s8 }
  0x22   : > { %s734_s9 = scalar_lea.vmem %s733_s8, 3072  ;;  %p735_p11 = scmp.lt.s32.totalorder %s905_s7, %s733_s8 }
  0x23   : > { %p730_p12 = pnand %p728_p9, %p714_p13  ;;  %p736_p2 = scmp.lt.s32.totalorder %s734_s9, %s727_s28 }
  0x25   : > { %p731_p0 = pneg %p730_p12  ;;  %p737_p3 = por %p736_p2, %p735_p11 }
  0x27   : > { %p738_p4 = pnand %p737_p3, %p731_p0 }
  0x29   : > { %741 = shalt.err (!%p738_p4)
}
  0x2a   : > { %s811_s10 = smov 256   ;;  %s812_s11 = smov 128  }
  0x2b   : > { %s813_s23 = smov 8   ;;  %p170_p13 = scmp.lt.s32.totalorder %s808_s19, 5 }
  0x2c   : > { %637 = dma.hbm_to_vmem [thread:$0]  (!%p896_p10), %s910_s12, 1536, %s905_s7, %s913_s20, %s811_s10, %s812_s11, %s813_s23  }
  0x2d   : > { %p1174_p1 = scmp.ge.s32.totalorder %s808_s19, 1 }
  0x2f   : > { %p171_p5 = pnand %p1174_p1, %p170_p13 }
  0x30   : > { %s176_s24 = sand.u32 (!%p171_p5), 1, %s784_s13  }
  0x31   : > { %174 = sbr.rel (%p171_p5) target bundleno = 383 (0x17f), region = 32  ;;  %s177_s27 = scalar_lea.sflag (!%p171_p5), [#allocation3], %s176_s24 }
  0x32   : > { %s631_s26 = smul.u32 (!%p171_p5), 96, %s176_s24 }
  0x34   : > { %s945_s29 = scalar_lea.vmem (!%p171_p5), [#allocation2], %s631_s26 }
  0x38   : > { %775 = dma.done.wait (%p888_p7), %s177_s27, 1536  }
  0x39   : > { %777 = vsyncadd (%p888_p7), %s177_s27, 4294965760  ;;  %v814_v0 = vmov 0   ;;  %v388_v1 = vld [vmem:[%s1170_s2] sm:$0xff]  ;;  %v306_v3 = vld [vmem:[%s1169_s1 + $0x10] sm:$0xff]  ;;  %s624_s27 = sshll.u32 %s792_s15, 4  ;;  %p208_p7 = scmp.lt.s32.totalorder %s796_s16, 1 }
  0x3a   : > { %709 = vset.pattern.permute.xlu1 %v814_v0  ;;  %708 = vset.pattern.permute.xlu0 %v814_v0  ;;  %v304_v2 = vld [vmem:[%s1169_s1] sm:$0xff]  ;;  %v305_v4 = vld [vmem:[%s1169_s1 + $0x8] sm:$0xff]  ;;  %v307_v5 = vld [vmem:[%s1169_s1 + $0x18] sm:$0xff]  ;;  %p210_p10 = scmp.lt.s32.totalorder %s624_s27, 31  ;;  %vm504_vm0 = vcmask 785408  }
  0x3b   : > { %402 = vperm.xlu1 %709, %v388_v1   ;;  %318 = vperm.xlu0 %708, %v304_v2   ;;  %v389_v6 = vld [vmem:[%s1170_s2 + $0x8] sm:$0xff]  ;;  %v970_v7 = vld [vmem:[%s945_s29] sm:$0xff]  ;;  %v976_v9 = vld [vmem:[%s945_s29 + $0x10] sm:$0xff]  ;;  %s1189_s16 = smov (!%p208_p7, %s796_s16), 1 }
  0x3c   : > { %v973_v8 = vld [vmem:[%s945_s29 + $0x8] sm:$0xff]  ;;  %v308_v11 = vld [vmem:[%s1169_s1 + $0x20] sm:$0xff]  ;;  %v390_v12 = vld [vmem:[%s1170_s2 + $0x10] sm:$0xff]  ;;  %s1191_s27 = smov (!%p210_p10, %s624_s27), 31  ;;  %s625_s30 = sshll.u32 %s1189_s16, 5 }
  0x3d   : > { %v229_v10 = vadd.f32 %v973_v8, %v970_v7  ;;  %v987_v13 = vld [vmem:[%s945_s29 + $0x18] sm:$0xff]  ;;  %v991_v15 = vld [vmem:[%s945_s29 + $0x20] sm:$0xff]  ;;  %v309_v17 = vld [vmem:[%s1169_s1 + $0x28] sm:$0xff]  ;;  %s213_s7 = sadd.s32 %s625_s30, %s1191_s27 }
  0x3e   : > { %v391_v18 = vld [vmem:[%s1170_s2 + $0x18] sm:$0xff]  ;;  %v222_v19 = vld [vmem:[%s945_s29 + $0x28] sm:$0xff]  ;;  %v223_v21 = vld [vmem:[%s945_s29 + $0x30] sm:$0xff]  ;;  %s626_s12 = sshll.u32 %s213_s7, 3 }
  0x3f   : > { %328 = vperm.xlu1 %709, %v306_v3   ;;  %323 = vperm.xlu0 %708, %v305_v4   ;;  %v230_v14 = vadd.f32 %v229_v10, %v976_v9  ;;  %v310_v23 = vld [vmem:[%s1169_s1 + $0x30] sm:$0xff]  ;;  %v392_v24 = vld [vmem:[%s1170_s2 + $0x20] sm:$0xff]  ;;  %v224_v25 = vld [vmem:[%s945_s29 + $0x38] sm:$0xff]  ;;  %s1110_s25 = scalar_lea.vmem %s1171_s3, %s626_s12 }
  0x40   : > { %v225_v27 = vld [vmem:[%s945_s29 + $0x40] sm:$0xff]  ;;  %v311_v29 = vld [vmem:[%s1169_s1 + $0x38] sm:$0xff]  ;;  %v393_v30 = vld [vmem:[%s1170_s2 + $0x28] sm:$0xff] }
  0x41   : > { %v231_v16 = vadd.f32 %v230_v14, %v987_v13  ;;  %v226_v31 = vld [vmem:[%s945_s29 + $0x48] sm:$0xff]  ;;  %v227_v33 = vld [vmem:[%s945_s29 + $0x50] sm:$0xff]  ;;  %v312_v35 = vld [vmem:[%s1169_s1 + $0x40] sm:$0xff] }
  0x42   : > { %v394_v36 = vld [vmem:[%s1170_s2 + $0x30] sm:$0xff]  ;;  %v228_v37 = vld [vmem:[%s945_s29 + $0x58] sm:$0xff]  ;;  %v313_v40 = vld [vmem:[%s1169_s1 + $0x48] sm:$0xff] }
  0x43   : > { %333 = vperm.xlu1 %709, %v307_v5   ;;  %407 = vperm.xlu0 %708, %v389_v6   ;;  %v232_v20 = vadd.f32 %v231_v16, %v991_v15  ;;  %v395_v41 = vld [vmem:[%s1170_s2 + $0x38] sm:$0xff]  ;;  %v314_v44 = vld [vmem:[%s1169_s1 + $0x50] sm:$0xff]  ;;  %v396_v45 = vld [vmem:[%s1170_s2 + $0x40] sm:$0xff] }
  0x44   : > { %v315_v48 = vld [vmem:[%s1169_s1 + $0x58] sm:$0xff]  ;;  %v397_v49 = vld [vmem:[%s1170_s2 + $0x48] sm:$0xff]  ;;  %v398_v53 = vld [vmem:[%s1170_s2 + $0x50] sm:$0xff] }
  0x45   : > { %v233_v22 = vadd.f32 %v232_v20, %v222_v19  ;;  %v399_v52 = vld [vmem:[%s1170_s2 + $0x58] sm:$0xff] }
  0x47   : > { %338 = vperm.xlu1 %709, %v308_v11   ;;  %412 = vperm.xlu0 %708, %v390_v12   ;;  %v234_v26 = vadd.f32 %v233_v22, %v223_v21 }
  0x49   : > { %v235_v28 = vadd.f32 %v234_v26, %v224_v25 }
  0x4b   : > { %343 = vperm.xlu1 %709, %v309_v17   ;;  %417 = vperm.xlu0 %708, %v391_v18   ;;  %v236_v32 = vadd.f32 %v235_v28, %v225_v27 }
  0x4d   : > { %v237_v34 = vadd.f32 %v236_v32, %v226_v31 }
  0x4f   : > { %348 = vperm.xlu1 %709, %v310_v23   ;;  %422 = vperm.xlu0 %708, %v392_v24   ;;  %v238_v38 = vadd.f32 %v237_v34, %v227_v33 }
  0x51   : > { %v239_v39 = vadd.f32 %v238_v38, %v228_v37 }
  0x53   : > { %353 = vperm.xlu1 %709, %v311_v29   ;;  %427 = vperm.xlu0 %708, %v393_v30   ;;  %v240_v42 = vrot.slane %v239_v39, 4 }
  0x55   : > { %v241_v43 = vadd.f32 %v240_v42, %v239_v39 }
  0x57   : > { %358 = vperm.xlu1 %709, %v312_v35   ;;  %432 = vperm.xlu0 %708, %v394_v36   ;;  %v242_v46 = vrot.slane %v241_v43, 2 }
  0x59   : > { %v243_v47 = vadd.f32 %v242_v46, %v241_v43 }
  0x5b   : > { %363 = vperm.xlu1 %709, %v313_v40   ;;  %437 = vperm.xlu0 %708, %v395_v41   ;;  %v244_v50 = vrot.slane %v243_v47, 1 }
  0x5d   : > { %v245_v51 = vadd.f32 %v244_v50, %v243_v47 }
  0x5f   : > { %368 = vperm.xlu1 %709, %v314_v44   ;;  %442 = vperm.xlu0 %708, %v396_v45   ;;  %v247_v54 = vmul.f32 0.010416667, %v245_v51 }
  0x61   : > { %v248_v55 = vsub.f32 %v970_v7, %v247_v54  ;;  %v249_v56 = vsub.f32 %v973_v8, %v247_v54  ;;  %v250_v57 = vsub.f32 %v976_v9, %v247_v54  ;;  %v251_v58 = vsub.f32 %v987_v13, %v247_v54 }
  0x62   : > { %v252_v61 = vsub.f32 %v991_v15, %v247_v54  ;;  %v1055_v63 = vsub.f32 %v222_v19, %v247_v54  ;;  %v1057_v2 = vsub.f32 %v223_v21, %v247_v54  ;;  %v1059_v5 = vsub.f32 %v224_v25, %v247_v54 }
  0x63   : > { %373 = vperm.xlu1 %709, %v315_v48   ;;  %447 = vperm.xlu0 %708, %v397_v49   ;;  %v260_v59 = vmul.f32 %v248_v55, %v248_v55  ;;  %v261_v60 = vmul.f32 %v249_v56, %v249_v56  ;;  %v262_v62 = vmul.f32 %v250_v57, %v250_v57 }
  0x64   : > { %v263_v0 = vmul.f32 %v251_v58, %v251_v58  ;;  %v264_v3 = vmul.f32 %v252_v61, %v252_v61  ;;  %v265_v6 = vmul.f32 %v1055_v63, %v1055_v63  ;;  %v1063_v8 = vsub.f32 %v225_v27, %v247_v54 }
  0x65   : > { %v272_v1 = vadd.f32 %v261_v60, %v260_v59  ;;  %v266_v9 = vmul.f32 %v1057_v2, %v1057_v2  ;;  %v267_v11 = vmul.f32 %v1059_v5, %v1059_v5  ;;  %v1069_v13 = vsub.f32 %v226_v31, %v247_v54 }
  0x66   : > { %v268_v14 = vmul.f32 %v1063_v8, %v1063_v8  ;;  %v1073_v17 = vsub.f32 %v227_v33, %v247_v54  ;;  %v1077_v20 = vsub.f32 %v228_v37, %v247_v54 }
  0x67   : > { %457 = vperm.xlu1 %709, %v399_v52   ;;  %452 = vperm.xlu0 %708, %v398_v53   ;;  %v273_v4 = vadd.f32 %v272_v1, %v262_v62  ;;  %v269_v18 = vmul.f32 %v1069_v13, %v1069_v13 }
  0x68   : > { %v270_v21 = vmul.f32 %v1073_v17, %v1073_v17  ;;  %v271_v23 = vmul.f32 %v1077_v20, %v1077_v20 }
  0x69   : > { %v274_v7 = vadd.f32 %v273_v4, %v263_v0 }
  0x6b   : > { %v275_v10 = vadd.f32 %v274_v7, %v264_v3 }
  0x6d   : > { %v276_v12 = vadd.f32 %v275_v10, %v265_v6 }
  0x6f   : > { %v277_v15 = vadd.f32 %v276_v12, %v266_v9 }
  0x71   : > { %v278_v16 = vadd.f32 %v277_v15, %v267_v11 }
  0x73   : > { %v279_v19 = vadd.f32 %v278_v16, %v268_v14 }
  0x75   : > { %v280_v22 = vadd.f32 %v279_v19, %v269_v18 }
  0x77   : > { %v281_v24 = vadd.f32 %v280_v22, %v270_v21 }
  0x79   : > { %v282_v25 = vadd.f32 %v281_v24, %v271_v23 }
  0x7b   : > { %v283_v26 = vrot.slane %v282_v25, 4 }
  0x7d   : > { %v284_v27 = vadd.f32 %v283_v26, %v282_v25 }
  0x7f   : > { %v285_v28 = vrot.slane %v284_v27, 2 }
  0x81   : > { %v286_v29 = vadd.f32 %v285_v28, %v284_v27 }
  0x83   : > { %v287_v30 = vrot.slane %v286_v29, 1 }
  0x85   : > { %v288_v31 = vadd.f32 %v287_v30, %v286_v29 }
  0x87   : > { %v289_v32 = vmul.f32 0.010416667, %v288_v31 }
  0x89   : > { %v290_v33 = vadd.f32 1e-05, %v289_v32 }
  0x8b   : > { %710 = vrsqrt.f32 %v290_v33 }
  0x95   : > { %v1083_v34 = vpop.eup %710 }
  0x96   : > { %v292_v35 = vmul.f32 %v1083_v34, %v248_v55  ;;  %v293_v40 = vmul.f32 %v1083_v34, %v249_v56  ;;  %v294_v43 = vmul.f32 %v1083_v34, %v250_v57  ;;  %v295_v49 = vmul.f32 %v1083_v34, %v251_v58 }
  0x97   : > { %v296_v54 = vmul.f32 %v1083_v34, %v252_v61  ;;  %v297_v57 = vmul.f32 %v1083_v34, %v1055_v63  ;;  %v298_v3 = vmul.f32 %v1083_v34, %v1057_v2  ;;  %v299_v9 = vmul.f32 %v1083_v34, %v1059_v5 }
  0x98   : > { %v300_v14 = vmul.f32 %v1083_v34, %v1063_v8  ;;  %v301_v19 = vmul.f32 %v1083_v34, %v1069_v13  ;;  %v302_v24 = vmul.f32 %v1083_v34, %v1073_v17  ;;  %v303_v28 = vmul.f32 %v1083_v34, %v1077_v20 }
  0xba   : > { %v403_v36 = vpop.permute.xlu1 %402  ;;  %v319_v37 = vpop.permute.xlu0 %318 }
  0xbb   : > { %v376_v38 = vmul.f32 %v319_v37, %v292_v35 }
  0xbd   : > { %v460_v39 = vadd.f32 %v403_v36, %v376_v38 }
  0xbe   : > { %v329_v41 = vpop.permute.xlu1 %328  ;;  %v324_v42 = vpop.permute.xlu0 %323 }
  0xbf   : > { %472 = vxpose.xlu0.b32.start [1/12] (short) %v460_v39, 128  ;;  %v377_v44 = vmul.f32 %v324_v42, %v293_v40  ;;  %v378_v48 = vmul.f32 %v329_v41, %v294_v43 }
  0xc2   : > { %v334_v45 = vpop.permute.xlu1 %333  ;;  %v408_v46 = vpop.permute.xlu0 %407 }
  0xc3   : > { %v461_v47 = vadd.f32 %v408_v46, %v377_v44  ;;  %v379_v53 = vmul.f32 %v334_v45, %v295_v49 }
  0xc5   : > { %473 = vxpose.xlu0.b32.cont [2/12] (short) %v461_v47, 128 }
  0xc6   : > { %v339_v50 = vpop.permute.xlu1 %338  ;;  %v413_v51 = vpop.permute.xlu0 %412 }
  0xc7   : > { %v462_v52 = vadd.f32 %v413_v51, %v378_v48  ;;  %v380_v60 = vmul.f32 %v339_v50, %v296_v54 }
  0xc9   : > { %474 = vxpose.xlu0.b32.cont [3/12] (short) %v462_v52, 128 }
  0xca   : > { %v344_v55 = vpop.permute.xlu1 %343  ;;  %v418_v56 = vpop.permute.xlu0 %417 }
  0xcb   : > { %v463_v59 = vadd.f32 %v418_v56, %v379_v53  ;;  %v381_v58 = vmul.f32 %v344_v55, %v297_v57 }
  0xcd   : > { %475 = vxpose.xlu0.b32.cont [4/12] (short) %v463_v59, 128 }
  0xce   : > { %v349_v62 = vpop.permute.xlu1 %348  ;;  %v423_v0 = vpop.permute.xlu0 %422 }
  0xcf   : > { %v464_v1 = vadd.f32 %v423_v0, %v380_v60  ;;  %v382_v7 = vmul.f32 %v349_v62, %v298_v3 }
  0xd1   : > { %476 = vxpose.xlu0.b32.cont [5/12] (short) %v464_v1, 128 }
  0xd2   : > { %v354_v4 = vpop.permute.xlu1 %353  ;;  %v428_v6 = vpop.permute.xlu0 %427 }
  0xd3   : > { %v465_v61 = vadd.f32 %v428_v6, %v381_v58  ;;  %v383_v12 = vmul.f32 %v354_v4, %v299_v9 }
  0xd5   : > { %477 = vxpose.xlu0.b32.cont [6/12] (short) %v465_v61, 128 }
  0xd6   : > { %v359_v10 = vpop.permute.xlu1 %358  ;;  %v433_v11 = vpop.permute.xlu0 %432 }
  0xd7   : > { %v466_v63 = vadd.f32 %v433_v11, %v382_v7  ;;  %v384_v18 = vmul.f32 %v359_v10, %v300_v14 }
  0xd9   : > { %478 = vxpose.xlu0.b32.cont [7/12] (short) %v466_v63, 128 }
  0xda   : > { %v364_v15 = vpop.permute.xlu1 %363  ;;  %v438_v16 = vpop.permute.xlu0 %437 }
  0xdb   : > { %v467_v2 = vadd.f32 %v438_v16, %v383_v12  ;;  %v385_v23 = vmul.f32 %v364_v15, %v301_v19 }
  0xdd   : > { %479 = vxpose.xlu0.b32.cont [8/12] (short) %v467_v2, 128 }
  0xde   : > { %v369_v21 = vpop.permute.xlu1 %368  ;;  %v443_v22 = vpop.permute.xlu0 %442 }
  0xdf   : > { %v468_v5 = vadd.f32 %v443_v22, %v384_v18  ;;  %v386_v27 = vmul.f32 %v369_v21, %v302_v24 }
  0xe1   : > { %480 = vxpose.xlu0.b32.cont [9/12] (short) %v468_v5, 128 }
  0xe2   : > { %v374_v8 = vpop.permute.xlu1 %373  ;;  %v448_v25 = vpop.permute.xlu0 %447 }
  0xe3   : > { %v469_v26 = vadd.f32 %v448_v25, %v385_v23  ;;  %v387_v31 = vmul.f32 %v374_v8, %v303_v28 }
  0xe5   : > { %481 = vxpose.xlu0.b32.cont [10/12] (short) %v469_v26, 128 }
  0xe6   : > { %v453_v13 = vpop.permute.xlu0 %452  ;;  %v458_v30 = vpop.permute.xlu1 %457 }
  0xe7   : > { %v470_v29 = vadd.f32 %v453_v13, %v386_v27  ;;  %v471_v32 = vadd.f32 %v458_v30, %v387_v31 }
  0xe9   : > { %482 = vxpose.xlu0.b32.cont [11/12] (short) %v470_v29, 128 }
  0xed   : > { %483 = vxpose.xlu0.b32.end [12/12] (short) %v471_v32, 128 }
 0x141   : > { %v488_v17 = vpop.trf.xlu0 }
 0x142   : > { %505 = vst.msk [vmem:[%s1110_s25] sm:$0xff] %vm504_vm0, %v488_v17 }
 0x145   : > { %v489_v20 = vpop.trf.xlu0 }
 0x146   : > { %506 = vst.msk [vmem:[%s1110_s25 + $0x8] sm:$0xff] %vm504_vm0, %v489_v20 }
 0x149   : > { %v490_v33 = vpop.trf.xlu0 }
 0x14a   : > { %507 = vst.msk [vmem:[%s1110_s25 + $0x10] sm:$0xff] %vm504_vm0, %v490_v33 }
 0x14d   : > { %v491_v34 = vpop.trf.xlu0 }
 0x14e   : > { %508 = vst.msk [vmem:[%s1110_s25 + $0x18] sm:$0xff] %vm504_vm0, %v491_v34 }
 0x151   : > { %v492_v35 = vpop.trf.xlu0 }
 0x152   : > { %509 = vst.msk [vmem:[%s1110_s25 + $0x20] sm:$0xff] %vm504_vm0, %v492_v35 }
 0x155   : > { %v493_v36 = vpop.trf.xlu0 }
 0x156   : > { %510 = vst.msk [vmem:[%s1110_s25 + $0x28] sm:$0xff] %vm504_vm0, %v493_v36 }
 0x159   : > { %v494_v37 = vpop.trf.xlu0 }
 0x15a   : > { %511 = vst.msk [vmem:[%s1110_s25 + $0x30] sm:$0xff] %vm504_vm0, %v494_v37 }
 0x15d   : > { %v495_v38 = vpop.trf.xlu0 }
 0x15e   : > { %512 = vst.msk [vmem:[%s1110_s25 + $0x38] sm:$0xff] %vm504_vm0, %v495_v38 }
 0x161   : > { %v496_v39 = vpop.trf.xlu0 }
 0x162   : > { %513 = vst.msk [vmem:[%s1110_s25 + $0x40] sm:$0xff] %vm504_vm0, %v496_v39 }
 0x165   : > { %v497_v40 = vpop.trf.xlu0 }
 0x166   : > { %514 = vst.msk [vmem:[%s1110_s25 + $0x48] sm:$0xff] %vm504_vm0, %v497_v40 }
 0x169   : > { %v498_v41 = vpop.trf.xlu0 }
 0x16a   : > { %515 = vst.msk [vmem:[%s1110_s25 + $0x50] sm:$0xff] %vm504_vm0, %v498_v41 }
 0x16d   : > { %v499_v42 = vpop.trf.xlu0 }
 0x16e   : > { %516 = vst.msk [vmem:[%s1110_s25 + $0x58] sm:$0xff] %vm504_vm0, %v499_v42 }
 0x171   : > { %v500_v43 = vpop.trf.xlu0 }
 0x172   : > { %517 = vst.msk [vmem:[%s1110_s25 + $0x60] sm:$0xff] %vm504_vm0, %v500_v43 }
 0x175   : > { %v501_v44 = vpop.trf.xlu0 }
 0x176   : > { %518 = vst.msk [vmem:[%s1110_s25 + $0x68] sm:$0xff] %vm504_vm0, %v501_v44 }
 0x179   : > { %v502_v45 = vpop.trf.xlu0 }
 0x17a   : > { %519 = vst.msk [vmem:[%s1110_s25 + $0x70] sm:$0xff] %vm504_vm0, %v502_v45 }
 0x17d   : > { %v503_v46 = vpop.trf.xlu0 }
 0x17e   : > { %520 = vst.msk [vmem:[%s1110_s25 + $0x78] sm:$0xff] %vm504_vm0, %v503_v46 }
 0x17f PF: > { %s16_s19 = sadd.s32 1, %s808_s19   ;;  %s1175_s12 = smov %s784_s13 }
 0x180   : > { %p13_p11 = scmp.ge.s32.totalorder %s16_s19, 6   ;;  %s1176_s13 = smov %s788_s14 }
 0x181   : > { %s1177_s14 = smov %s901_s4  ;;  %s1178_s15 = smov %s800_s17 }
 0x182   : > { %s1179_s16 = smov %s804_s18  ;;  %s1180_s17 = smov %s1183_s21 }
 0x183   : > { %s1181_s18 = smov %s1187_s22  ;;  %15 = sbr.rel (!%p13_p11) target bundleno = 5 (0x5), region = 72 }
 0x18a   :  { %551 = vsyncpa [#allocation3], 1 }
 0x18b   :  { %553 = vsyncpa [#allocation3 + $0x1], 1 }

</bundles_post_ra>
